<compile_context>
chip_gen: v5e
topology: v5e:2x2
jax: 0.10.0
libtpu: 0.0.40
codegen_flags: <defaults>
</compile_context>

<pallas_src>
import functools

import jax
import jax.numpy as jnp
from jax.experimental import pallas as pl
from jax.experimental.pallas import tpu as pltpu

_LANES = 128
_MIB = 1024 * 1024


def _round_up(x, m):
    return -(-x // m) * m


def _vmem_budget_bytes():
    """Scoped-VMEM budget derived from the chip's physical VMEM capacity.

    v5e/v6e (128 MiB physical) -> 64 MiB, v7x (64 MiB physical) -> 48 MiB,
    unknown / query failure -> 48 MiB (safe on every generation).
    """
    cap = 64 * _MIB
    try:
        info = pltpu.get_tpu_info()
        cap = int(getattr(info, "vmem_capacity_bytes", cap)) or cap
    except Exception:
        pass
    return max(min(3 * cap // 4, 64 * _MIB), 32 * _MIB)


def _plan_tiles(b, c, itemsize, has_weight, max_rows=None):
    """Pick (rows per grid step, number of tiles, vmem limit).

    Budgets the whole per-step working set:
      * 2 x native-dtype logits block (double-buffered input DMA)
      * ~5 x full-tile f32 temporaries (upcast / shifted / exp / iota / onehot)
      * lane-padded (rows, 1) int32 target (+ f32 per-sample weight) columns
    and additionally targets ~4 MiB of *raw* logits per block so the per-step
    DMA dwarfs the fixed grid-step overhead.  Rows are capped at 4096 so the
    lane-padded per-row columns stay small, and kept a multiple of 16 for bf16
    sublane packing.
    """
    budget = _vmem_budget_bytes()
    usable = (3 * budget) // 4                      # slack for compiler scratch / spills
    n_cols = 10 if has_weight else 8                # (rows, 1) f32/i32 column temporaries
    per_row = 2 * c * itemsize + 5 * c * 4 + n_cols * 512
    rows_vmem = usable // max(per_row, 1)
    rows_dma = (4 * _MIB) // max(c * itemsize, 1)   # ~4 MiB of raw logits per block
    cap_rows = max_rows if max_rows is not None else 4096
    rows = min(rows_vmem, rows_dma, cap_rows)
    rows = max(16, (rows // 16) * 16)

    n_tiles = -(-b // rows)
    tb = _round_up(-(-b // n_tiles), 16)            # re-balance: padding waste < 16*n_tiles rows
    return tb, n_tiles, budget


def _focal_pow(one_minus_pt, gamma):
    """(1 - pt)**gamma without an EUP pow for small integer gamma."""
    if gamma == 0.0:
        return jnp.ones_like(one_minus_pt)
    if float(gamma).is_integer() and 1.0 <= gamma <= 8.0:
        out = one_minus_pt
        for _ in range(int(gamma) - 1):
            out = out * one_minus_pt
        return out
    return one_minus_pt ** gamma


def _focal_loss_kernel(pred_ref, tgt_ref, *rest, gamma, reduction, has_weight):
    if has_weight:
        wt_ref, out_ref = rest
    else:
        (out_ref,) = rest

    # Single f32 upcast, reused by every full-tile pass below.
    # TODO(synk): on v7x with bf16 inputs the row-max (a pure selection) could
    # run in bf16 to shave one full-tile pass; kept f32 for v5e and exactness.
    logits = pred_ref[...].astype(jnp.float32)              # [TB, C]
    tgt = tgt_ref[...]                                       # [TB, 1] int32 (-1 = pad)

    # Numerically stable log-softmax pieces along the class (lane) axis.
    m = jnp.max(logits, axis=-1, keepdims=True)              # [TB, 1]
    shifted = logits - m
    lse = jnp.log(jnp.sum(jnp.exp(shifted), axis=-1, keepdims=True))

    # Gather the shifted logit of the target class via one-hot compare.
    classes = jax.lax.broadcasted_iota(jnp.int32, shifted.shape, 1)
    onehot = classes == tgt                                   # [TB, C] bool
    tgt_shifted = jnp.sum(jnp.where(onehot, shifted, 0.0), axis=-1, keepdims=True)

    ce = lse - tgt_shifted                                    # unweighted CE  [TB, 1]
    pt = jnp.exp(-ce)                                         # softmax prob of target
    one_minus_pt = jnp.maximum(1.0 - pt, 0.0)                 # guard: pt can exceed 1 by an ulp

    if has_weight:
        wce = wt_ref[...] * ce                                # w_t gathered in the wrapper
    else:
        wce = ce

    focal = _focal_pow(one_minus_pt, gamma) * wce             # [TB, 1]
    focal = jnp.where(tgt >= 0, focal, 0.0)                   # zero out padded rows

    if reduction == "none":
        out_ref[...] = focal                                  # (TB, 1) block
    else:
        # Per-tile partial sum written as a lane-dense (1, 128) block.
        out_ref[...] = jnp.broadcast_to(jnp.sum(focal), (1, _LANES))


def focal_loss(predicted, target, weight=None, gamma=2, reduction="mean",
               max_rows=None):
    """predicted: [B, C] float (f32 or bf16), target: [B] int. Mirrors FocalLoss."""
    b, c = predicted.shape
    has_weight = weight is not None
    itemsize = jnp.dtype(predicted.dtype).itemsize
    tb, n_tiles, vmem_budget = _plan_tiles(b, c, itemsize, has_weight, max_rows)
    b_pad = tb * n_tiles

    tgt2d = target.astype(jnp.int32).reshape(b, 1)
    pred = predicted
    if b_pad != b:
        pred = jnp.pad(pred, ((0, b_pad - b), (0, 0)))
        tgt2d = jnp.pad(tgt2d, ((0, b_pad - b), (0, 0)), constant_values=-1)

    in_specs = [
        pl.BlockSpec((tb, c), lambda i: (i, 0)),              # logits tile (native dtype)
        pl.BlockSpec((tb, 1), lambda i: (i, 0)),              # target tile
    ]
    args = [pred, tgt2d]
    if has_weight:
        w = jnp.asarray(weight, dtype=jnp.float32).reshape(c)
        wt = w[target.astype(jnp.int32)].reshape(b, 1)        # per-sample weight (tiny XLA gather)
        if b_pad != b:
            wt = jnp.pad(wt, ((0, b_pad - b), (0, 0)))
        in_specs.append(pl.BlockSpec((tb, 1), lambda i: (i, 0)))
        args.append(wt)

    if reduction == "none":
        out_shape = jax.ShapeDtypeStruct((b_pad, 1), jnp.float32)
        out_spec = pl.BlockSpec((tb, 1), lambda i: (i, 0))
    else:
        out_shape = jax.ShapeDtypeStruct((1, n_tiles * _LANES), jnp.float32)
        out_spec = pl.BlockSpec((1, _LANES), lambda i: (0, i))

    kernel = functools.partial(
        _focal_loss_kernel,
        gamma=float(gamma),
        reduction=reduction,
        has_weight=has_weight,
    )

    result = pl.pallas_call(
        kernel,
        out_shape=out_shape,
        grid=(n_tiles,),
        in_specs=in_specs,
        out_specs=out_spec,
        compiler_params=pltpu.CompilerParams(
            dimension_semantics=("parallel",),
            vmem_limit_bytes=int(vmem_budget),
        ),
    )(*args)

    if reduction == "none":
        return result[:b, 0]
    partials = result.reshape(n_tiles, _LANES)[:, 0]          # tiny; reduced by XLA
    total = jnp.sum(partials)
    if reduction == "mean":
        # Module spec: focal_loss.mean() over the batch (the module calls .mean()
        # itself; it does NOT use torch's weighted-CE normalization by sum(w[t])).
        return total / jnp.float32(b)
    return total                                              # 'sum'


def _reference(predicted, target, weight=None, gamma=2, reduction="mean"):
    logp = jax.nn.log_softmax(predicted.astype(jnp.float32), axis=-1)
    ce = -jnp.take_along_axis(logp, target[:, None].astype(jnp.int32), axis=-1)[:, 0]
    pt = jnp.exp(-ce)
    wce = ce if weight is None else weight[target] * ce
    focal = (1.0 - pt) ** gamma * wce
    if reduction == "none":
        return focal
    if reduction == "mean":
        return jnp.mean(focal)
    return jnp.sum(focal)


if __name__ == "__main__":
    key = jax.random.PRNGKey(0)
    k1, k2, k3 = jax.random.split(key, 3)
    B, C = 8, 32
    predicted = jax.random.normal(k1, (B, C), dtype=jnp.float32)
    target = jax.random.randint(k2, (B,), 0, C, dtype=jnp.int32)
    class_w = jax.random.uniform(k3, (C,), minval=0.5, maxval=1.5, dtype=jnp.float32)

    # Default module config: weight=None, gamma=2, reduction='mean'.
    loss = jax.block_until_ready(focal_loss(predicted, target))
    ref = _reference(predicted, target)
    assert jnp.allclose(loss, ref, atol=1e-5, rtol=1e-5), (loss, ref)

    # Other reductions / class weights.
    for kwargs in (
        dict(reduction="sum"),
        dict(reduction="none"),
        dict(weight=class_w, reduction="mean"),
        dict(weight=class_w, reduction="none"),
    ):
        out = jax.block_until_ready(focal_loss(predicted, target, **kwargs))
        ref = _reference(predicted, target, **kwargs)
        assert jnp.allclose(out, ref, atol=1e-5, rtol=1e-5), (kwargs, out, ref)

    # bf16 logits stream at native width (cast to f32 happens inside the kernel).
    pred_bf16 = predicted.astype(jnp.bfloat16)
    out = jax.block_until_ready(focal_loss(pred_bf16, target))
    ref = _reference(pred_bf16, target)
    assert jnp.allclose(out, ref, atol=1e-5, rtol=1e-5), (out, ref)

    # Multi-tile path (forced small tile) to exercise the partial-sum combine.
    B2 = 48
    pred2 = jax.random.normal(k1, (B2, C), dtype=jnp.float32)
    tgt2 = jax.random.randint(k2, (B2,), 0, C, dtype=jnp.int32)
    for red in ("mean", "sum", "none"):
        out = jax.block_until_ready(
            focal_loss(pred2, tgt2, weight=class_w, reduction=red, max_rows=16))
        ref = _reference(pred2, tgt2, weight=class_w, reduction=red)
        assert jnp.allclose(out, ref, atol=1e-5, rtol=1e-5), (red, out, ref)

    print("KERNEL_OK")
</pallas_src>

<mosaic_0001>
module attributes {stable_mosaic.version = 11 : i64} {
  func.func @_focal_loss_kernel(%arg0: i32, %arg1: memref<16x32xf32, #tpu.memory_space<vmem>>, %arg2: memref<16x1xi32, #tpu.memory_space<vmem>>, %arg3: memref<1x128xf32, #tpu.memory_space<vmem>>) attributes {dimension_semantics = [#tpu.dimension_semantics<parallel>], iteration_bounds = array<i64: 1>, scalar_prefetch = 0 : i64, scratch_operands = 0 : i64, tpu.core_type = #tpu.core_type<tc>, window_params = [{transform_indices = @transform_0, window_bounds = array<i64: 16, 32>}, {transform_indices = @transform_1, window_bounds = array<i64: 16, 1>}, {transform_indices = @transform_2, window_bounds = array<i64: 1, 128>}]} {
    %c0 = arith.constant 0 : index
    %c0_0 = arith.constant 0 : index
    %0 = vector.load %arg1[%c0, %c0_0] : memref<16x32xf32, #tpu.memory_space<vmem>>, vector<16x32xf32>
    %c0_1 = arith.constant 0 : index
    %c0_2 = arith.constant 0 : index
    %1 = vector.load %arg2[%c0_1, %c0_2] : memref<16x1xi32, #tpu.memory_space<vmem>>, vector<16x1xi32>
    %cst = arith.constant dense<0xFF800000> : vector<16xf32>
    %2 = vector.multi_reduction <maximumf>, %0, %cst [1] : vector<16x32xf32> to vector<16xf32>
    %3 = vector.shape_cast %2 : vector<16xf32> to vector<16x1xf32>
    %4 = vector.broadcast %3 : vector<16x1xf32> to vector<16x32xf32>
    %5 = arith.subf %0, %4 : vector<16x32xf32>
    %6 = math.exp %5 : vector<16x32xf32>
    %cst_3 = arith.constant dense<0.000000e+00> : vector<16xf32>
    %7 = vector.multi_reduction <add>, %6, %cst_3 [1] : vector<16x32xf32> to vector<16xf32>
    %8 = vector.shape_cast %7 : vector<16xf32> to vector<16x1xf32>
    %9 = math.log %8 : vector<16x1xf32>
    %10 = tpu.iota {dimensions = array<i32: 1>} : vector<16x32xi32>
    %11 = vector.broadcast %1 : vector<16x1xi32> to vector<16x32xi32>
    %12 = arith.cmpi eq, %10, %11 : vector<16x32xi32>
    %cst_4 = arith.constant 0.000000e+00 : f32
    %13 = vector.broadcast %cst_4 : f32 to vector<16x32xf32>
    %14 = arith.select %12, %5, %13 : vector<16x32xi1>, vector<16x32xf32>
    %cst_5 = arith.constant dense<0.000000e+00> : vector<16xf32>
    %15 = vector.multi_reduction <add>, %14, %cst_5 [1] : vector<16x32xf32> to vector<16xf32>
    %16 = vector.shape_cast %15 : vector<16xf32> to vector<16x1xf32>
    %17 = arith.subf %9, %16 : vector<16x1xf32>
    %cst_6 = arith.constant 0.000000e+00 : f32
    %18 = vector.broadcast %cst_6 : f32 to vector<16x1xf32>
    %19 = arith.subf %18, %17 : vector<16x1xf32>
    %20 = math.exp %19 : vector<16x1xf32>
    %cst_7 = arith.constant 1.000000e+00 : f32
    %21 = vector.broadcast %cst_7 : f32 to vector<16x1xf32>
    %22 = arith.subf %21, %20 : vector<16x1xf32>
    %cst_8 = arith.constant 0.000000e+00 : f32
    %23 = vector.broadcast %cst_8 : f32 to vector<16x1xf32>
    %24 = arith.maximumf %22, %23 : vector<16x1xf32>
    %25 = arith.mulf %24, %24 : vector<16x1xf32>
    %26 = arith.mulf %25, %17 : vector<16x1xf32>
    %c0_i32 = arith.constant 0 : i32
    %27 = vector.broadcast %c0_i32 : i32 to vector<16x1xi32>
    %28 = arith.cmpi sge, %1, %27 : vector<16x1xi32>
    %cst_9 = arith.constant 0.000000e+00 : f32
    %29 = vector.broadcast %cst_9 : f32 to vector<16x1xf32>
    %30 = arith.select %28, %26, %29 : vector<16x1xi1>, vector<16x1xf32>
    %31 = vector.shape_cast %30 : vector<16x1xf32> to vector<1x16x1xf32>
    %cst_10 = arith.constant dense<0.000000e+00> : vector<1xf32>
    %32 = vector.multi_reduction <add>, %31, %cst_10 [1, 2] : vector<1x16x1xf32> to vector<1xf32>
    %33 = vector.shape_cast %32 : vector<1xf32> to vector<1x1x1xf32>
    %34 = vector.extract %33[0, 0, 0] : f32 from vector<1x1x1xf32>
    %35 = vector.broadcast %34 : f32 to vector<1x128xf32>
    %c0_11 = arith.constant 0 : index
    %c0_12 = arith.constant 0 : index
    %36 = vector.load %arg3[%c0_11, %c0_12] : memref<1x128xf32, #tpu.memory_space<vmem>>, vector<1x128xf32>
    tpu.vector_store %arg3[%c0_11, %c0_12], %35 {strides = array<i32>} : memref<1x128xf32, #tpu.memory_space<vmem>>, vector<1x128xf32>,
    return
  }
  func.func @transform_0(%arg0: i32) -> (i32, i32) {
    %c0_i32 = arith.constant 0 : i32
    %c0_i32_0 = arith.constant 0 : i32
    return %arg0, %c0_i32 : i32, i32
  }
  func.func @transform_1(%arg0: i32) -> (i32, i32) {
    %c0_i32 = arith.constant 0 : i32
    %c0_i32_0 = arith.constant 0 : i32
    return %arg0, %c0_i32 : i32, i32
  }
  func.func @transform_2(%arg0: i32) -> (i32, i32) {
    %c0_i32 = arith.constant 0 : i32
    %c0_i32_0 = arith.constant 0 : i32
    return %c0_i32, %arg0 : i32, i32
  }
}

</mosaic_0001>

<bundles_post_ra>
// kernel: tpu_custom_call.1
= control target key start
LH: loop header
LB: loop body
LE: loop exit
PB: predicated region body
PF: predicated region fallthrough
CT: control target
= control target key end

     0   :  { %vm16_vm0 = vcmask 261120   ;;  %v152_v3 = vmov 0   ;;  %s194_s0 = inlined_call_operand.vmem [shape: f32[16,32], index: 0, kind: input, shape index: {}]   ;;  %s195_s1 = inlined_call_operand.vmem [shape: s32[16,1], index: 1, kind: input, shape index: {}]   ;;  %s196_s2 = inlined_call_operand.hbm [shape: f32[1,128], index: 2, kind: output, shape index: {}]  }
   0x1   :  { %v12_v0 = vld [vmem:[%s194_s0] sm:$0xff]  ;;  %112 = vset.pattern.permute.xlu1 %v152_v3  ;;  %113 = vset.pattern.permute.xlu0 %v152_v3 }
   0x2   :  { %v175_v1 = vld [vmem:[%s195_s1] sm:$0xff]  ;;  %v17_v2 = vsel %vm16_vm0, %v12_v0, -inf }
   0x3   :  { %7 = vsyncpa [#allocation3], 0  ;;  %18 = vmax.xlane.f32.xlu0 %v17_v2  ;;  %42 = vperm.xlu1 %112, %v175_v1   ;;  %v13_v4 = vld [vmem:[%s194_s0 + $0x8] sm:$0xff]  ;;  %v39_v7 = vlaneseq  ;;  %vm73_vm3 = vcmp.ge.s32.totalorder %v175_v1, 0  ;;  %vm77_vm5 = vcmask 7168   ;;  %s153_s0 = smov [#allocation2]  }
   0x4   :  { %v20_v5 = vsel %vm16_vm0, %v13_v4, -inf  ;;  %v15_v6 = vld [vmem:[%s195_s1 + $0x8] sm:$0xff]  ;;  %s97_s1 = sshll.u32 %s153_s0, 4  ;;  %s99_s19 = sshll.u32 %s196_s2, 4  ;;  %s98_s1 = int_to_ptr.vmem [resolvable:$true] %s97_s1  ;;  %s100_s19 = int_to_ptr.hbm [resolvable:$true] %s99_s19 }
   0x5   :  { %v40_v8 = vand.u32 127, %v39_v7  ;;  %vm74_vm4 = vcmp.ge.s32.totalorder %v15_v6, 0 }
   0xb   :  { %21 = vmax.xlane.f32.xlu0 %v20_v5  ;;  %45 = vperm.xlu1 %112, %v15_v6  }
  0x75   :  { %v43_v9 = vpop.permute.xlu1 %42 }
  0x76   :  { %v19_v10 = vpop.xlane.xlu0 %18  ;;  %vm47_vm1 = vcmp.eq.s32.totalorder %v40_v8, %v43_v9 }
  0x77   :  { %v23_v11 = vsub.f32 %v12_v0, %v19_v10 }
  0x79   :  { %v25_v12 = vmul.f32 1.442695, %v23_v11  ;;  %v49_v13 = vsel %vm47_vm1, %v23_v11, 0.0 }
  0x7a   :  { %v51_v14 = vsel %vm16_vm0, %v49_v13, 0.0 }
  0x7b   :  { %114 = vpow2.f32 %v25_v12  ;;  %52 = vadd.xlane.f32.xlu0 %v51_v14 }
  0x7d   :  { %v46_v15 = vpop.permute.xlu1 %45 }
  0x7e   :  { %v22_v16 = vpop.xlane.xlu0 %21  ;;  %vm48_vm2 = vcmp.eq.s32.totalorder %v40_v8, %v46_v15 }
  0x7f   :  { %v24_v17 = vsub.f32 %v13_v4, %v22_v16 }
  0x81   :  { %v115_v18 = vpop.eup %114  ;;  %v27_v19 = vmul.f32 1.442695, %v24_v17  ;;  %v50_v20 = vsel %vm48_vm2, %v24_v17, 0.0 }
  0x82   :  { %v29_v21 = vsel %vm16_vm0, %v115_v18, 0.0  ;;  %v54_v22 = vsel %vm16_vm0, %v50_v20, 0.0 }
  0x83   :  { %116 = vpow2.f32 %v27_v19  ;;  %30 = vadd.xlane.f32.xlu2 %v29_v21  ;;  %55 = vadd.xlane.f32.xlu1 %v54_v22 }
  0x89   :  { %v117_v23 = vpop.eup %116 }
  0x8a   :  { %v32_v24 = vsel %vm16_vm0, %v117_v23, 0.0 }
  0x8b   :  { %33 = vadd.xlane.f32.xlu2 %v32_v24 }
  0xee   :  { %v53_v29 = vpop.xlane.xlu0 %52 }
  0xf6   :  { %v31_v25 = vpop.xlane.xlu2 %30  ;;  %v56_v35 = vpop.xlane.xlu1 %55 }
  0xf7   :  { %118 = vlog2.f32 %v31_v25 }
  0xfd   :  { %v119_v26 = vpop.eup %118 }
  0xfe   :  { %v36_v27 = vmul.f32 0.6931472, %v119_v26  ;;  %v34_v28 = vpop.xlane.xlu2 %33 }
  0xff   :  { %120 = vlog2.f32 %v34_v28 }
 0x100   :  { %v57_v30 = vsub.f32 %v36_v27, %v53_v29 }
 0x102   :  { %v59_v31 = vsub.f32 0.0, %v57_v30 }
 0x104   :  { %v61_v32 = vmul.f32 1.442695, %v59_v31 }
 0x105   :  { %v121_v33 = vpop.eup %120 }
 0x106   :  { %122 = vpow2.f32 %v61_v32  ;;  %v38_v34 = vmul.f32 0.6931472, %v121_v33 }
 0x108   :  { %v58_v36 = vsub.f32 %v38_v34, %v56_v35 }
 0x10a   :  { %v60_v37 = vsub.f32 0.0, %v58_v36 }
 0x10c   :  { %v123_v38 = vpop.eup %122  ;;  %v63_v39 = vmul.f32 1.442695, %v60_v37 }
 0x10d   :  { %v65_v40 = vsub.f32 1.0, %v123_v38 }
 0x10e   :  { %124 = vpow2.f32 %v63_v39 }
 0x10f   :  { %v67_v41 = vmax.f32 %v65_v40, 0.0 }
 0x111   :  { %v69_v42 = vmul.f32 %v67_v41, %v67_v41 }
 0x113   :  { %v71_v46 = vmul.f32 %v69_v42, %v57_v30 }
 0x114   :  { %v125_v43 = vpop.eup %124 }
 0x115   :  { %v66_v44 = vsub.f32 1.0, %v125_v43  ;;  %v75_v49 = vsel %vm73_vm3, %v71_v46, 0.0 }
 0x116   :  { %v78_v51 = vsel %vm77_vm5, %v75_v49, 0.0 }
 0x117   :  { %v68_v45 = vmax.f32 %v66_v44, 0.0 }
 0x119   :  { %v70_v47 = vmul.f32 %v68_v45, %v68_v45 }
 0x11b   :  { %v72_v48 = vmul.f32 %v70_v47, %v58_v36 }
 0x11d   :  { %v76_v50 = vsel %vm74_vm4, %v72_v48, 0.0 }
 0x11e   :  { %v79_v52 = vsel %vm77_vm5, %v76_v50, 0.0 }
 0x11f   :  { %v80_v53 = vadd.f32 %v79_v52, %v78_v51 }
 0x121   :  { %81 = vadd.xlane.f32.xlu2 %v80_v53 }
 0x194   :  { %v82_v54 = vpop.xlane.xlu2 %81 }
 0x195   :  { %v83_v55 = vrot.slane %v82_v54, 4 }
 0x197   :  { %v84_v56 = vadd.f32 %v83_v55, %v82_v54 }
 0x199   :  { %v85_v57 = vrot.slane %v84_v56, 2 }
 0x19b   :  { %v86_v58 = vadd.f32 %v85_v57, %v84_v56 }
 0x19d   :  { %v87_v59 = vrot.slane %v86_v58, 1 }
 0x19f   :  { %v88_v60 = vadd.f32 %v87_v59, %v86_v58 }
 0x1a1   :  { %108 = vpush %v88_v60 }
 0x1d2   :  { %s109_s20 = spop %108 }
 0x1d3   :  { %v90_v61 = vstv %s109_s20 }
 0x1d4   :  { %91 = vst [vmem:[#allocation2] sm:$0x1] %v90_v61 }
 0x1d5   :  { %102 = dma.vmem_to_hbm [thread:$0]  %s98_s1, 16, %s100_s19, [#allocation3]  }
 0x1d6   :  { %150 = dma.done.wait [#allocation3], 16  }
 0x1d7   :  { %151 = vsyncadd [#allocation3], 4294967280 }
 0x1d8   :  { %107 = vsyncpa [#allocation3], 1 }

</bundles_post_ra>
